<compile_context>
chip_gen: v5e
topology: v5e:2x2
jax: 0.10.0
libtpu: 0.0.40
codegen_flags: <defaults>
</compile_context>

<pallas_src>
import functools

import jax
import jax.numpy as jnp
from jax.experimental import pallas as pl
from jax.experimental.pallas import tpu as pltpu


# -----------------------------------------------------------------------------
# Shared MHA core (traced inside the kernels).
#   q:[L,E] f32, kv:[S,E] f32
#   wqT:[E,E] bf16, wkvT:[E,2E] bf16, woTh:[H,hd,E] bf16, biases f32
# Returns (attn_out:[L,E] f32, attn_avg:[L,S] f32)  (average_attn_weights=True)
# -----------------------------------------------------------------------------
def _mha_core(q, kv, wqT, bq, wkvT, bkv, woTh, bo, nhead):
    L, E = q.shape
    S = kv.shape[0]
    hd = E // nhead
    scale = 1.0 / float(hd) ** 0.5

    # fused in-projections (bf16 operands, f32 accumulation)
    qp = jnp.dot(q.astype(jnp.bfloat16), wqT,
                 preferred_element_type=jnp.float32) + bq          # [L, E]
    kvp = jnp.dot(kv.astype(jnp.bfloat16), wkvT,
                  preferred_element_type=jnp.float32) + bkv        # [S, 2E]
    kp = kvp[:, :E]
    vp = kvp[:, E:]

    attn_sum = jnp.zeros((L, S), jnp.float32)
    acc = jnp.zeros((L, E), jnp.float32)
    for h in range(nhead):                       # static loop, nhead is small
        lo = h * hd
        qh = qp[:, lo:lo + hd]
        kh = kp[:, lo:lo + hd]
        vh = vp[:, lo:lo + hd]

        s = jnp.dot(qh.astype(jnp.bfloat16), kh.T.astype(jnp.bfloat16),
                    preferred_element_type=jnp.float32) * scale    # [L, S]
        m = jnp.max(s, axis=-1, keepdims=True)
        e = jnp.exp(s - m)
        denom = jnp.sum(e, axis=-1, keepdims=True)
        p = e * pl.reciprocal(denom, approx=True)                  # softmax (f32)
        # TODO(synk): attention dropout omitted (eval mode => identity)
        attn_sum = attn_sum + p

        ctx_h = jnp.dot(p.astype(jnp.bfloat16), vh.astype(jnp.bfloat16),
                        preferred_element_type=jnp.float32)        # [L, hd]
        # per-head output projection + accumulate (no lane-axis concat)
        acc = acc + jnp.dot(ctx_h.astype(jnp.bfloat16), woTh[h],
                            preferred_element_type=jnp.float32)    # [L, E]

    out = acc + bo
    attn_avg = attn_sum * (1.0 / float(nhead))
    return out, attn_avg


# -----------------------------------------------------------------------------
# Kernel 1 (start layer): MHA + pos_tgt = attn_avg @ pos_src, fused.
# Per grid step (one batch element).
# -----------------------------------------------------------------------------
def _start_layer_kernel(q_ref, kv_ref, pos_ref,
                        wqT_ref, bq_ref, wkvT_ref, bkv_ref, woTh_ref, bo_ref,
                        out_ref, attn_ref, pos_out_ref, *, nhead):
    q = q_ref[0].astype(jnp.float32)          # [L, E]
    kv = kv_ref[0].astype(jnp.float32)        # [S, E]

    out, attn_avg = _mha_core(q, kv, wqT_ref[...], bq_ref[...],
                              wkvT_ref[...], bkv_ref[...],
                              woTh_ref[...], bo_ref[...], nhead)

    pos_out = jnp.dot(attn_avg, pos_ref[0].astype(jnp.float32),
                      preferred_element_type=jnp.float32)          # [L, P]

    out_ref[0] = out.astype(out_ref.dtype)
    attn_ref[0] = attn_avg.astype(attn_ref.dtype)
    pos_out_ref[0] = pos_out.astype(pos_out_ref.dtype)


# -----------------------------------------------------------------------------
# Kernel 2 (non-start layer): MHA + residual + LN1 + FFN(relu) + residual + LN2,
# fully fused.  Dropout1/2/3 are identity in eval mode.
# -----------------------------------------------------------------------------
def _full_layer_kernel(q_ref, kv_ref,
                       wqT_ref, bq_ref, wkvT_ref, bkv_ref, woTh_ref, bo_ref,
                       g1_ref, be1_ref, w1T_ref, b1_ref, w2T_ref, b2_ref,
                       g2_ref, be2_ref,
                       out_ref, attn_ref, *, nhead):
    eps = 1e-5
    q = q_ref[0].astype(jnp.float32)          # [L, D]
    kv = kv_ref[0].astype(jnp.float32)        # [S, D]

    ao, attn_avg = _mha_core(q, kv, wqT_ref[...], bq_ref[...],
                             wkvT_ref[...], bkv_ref[...],
                             woTh_ref[...], bo_ref[...], nhead)

    # residual + LayerNorm1 (f32)
    x = q + ao
    mu = jnp.mean(x, axis=-1, keepdims=True)
    var = jnp.mean(jnp.square(x - mu), axis=-1, keepdims=True)
    x = (x - mu) * jax.lax.rsqrt(var + eps) * g1_ref[...] + be1_ref[...]

    # FFN (bf16 matmuls, f32 accumulation)
    h = jnp.dot(x.astype(jnp.bfloat16), w1T_ref[...],
                preferred_element_type=jnp.float32) + b1_ref[...]
    h = jnp.maximum(h, 0.0)                    # relu (+ dropout2 identity)
    y = jnp.dot(h.astype(jnp.bfloat16), w2T_ref[...],
                preferred_element_type=jnp.float32) + b2_ref[...]

    # residual + LayerNorm2 (f32)
    x = x + y
    mu = jnp.mean(x, axis=-1, keepdims=True)
    var = jnp.mean(jnp.square(x - mu), axis=-1, keepdims=True)
    x = (x - mu) * jax.lax.rsqrt(var + eps) * g2_ref[...] + be2_ref[...]

    out_ref[0] = x.astype(out_ref.dtype)
    attn_ref[0] = attn_avg.astype(attn_ref.dtype)


# -----------------------------------------------------------------------------
# pallas_call wrappers
# -----------------------------------------------------------------------------
def _const_spec(arr):
    zeros = (0,) * arr.ndim
    return pl.BlockSpec(arr.shape, lambda n, _z=zeros: _z)


def start_layer_pallas(q_nle, kv_nse, pos_nsp, p, nhead):
    N, L, E = q_nle.shape
    S = kv_nse.shape[1]
    P = pos_nsp.shape[2]
    kernel = functools.partial(_start_layer_kernel, nhead=nhead)
    out, attn, pos_out = pl.pallas_call(
        kernel,
        out_shape=(jax.ShapeDtypeStruct((N, L, E), jnp.float32),
                   jax.ShapeDtypeStruct((N, L, S), jnp.float32),
                   jax.ShapeDtypeStruct((N, L, P), jnp.float32)),
        grid=(N,),
        in_specs=[pl.BlockSpec((1, L, E), lambda n: (n, 0, 0)),
                  pl.BlockSpec((1, S, E), lambda n: (n, 0, 0)),
                  pl.BlockSpec((1, S, P), lambda n: (n, 0, 0)),
                  _const_spec(p["wqT"]), _const_spec(p["bq"]),
                  _const_spec(p["wkvT"]), _const_spec(p["bkv"]),
                  _const_spec(p["woTh"]), _const_spec(p["bo"])],
        out_specs=(pl.BlockSpec((1, L, E), lambda n: (n, 0, 0)),
                   pl.BlockSpec((1, L, S), lambda n: (n, 0, 0)),
                   pl.BlockSpec((1, L, P), lambda n: (n, 0, 0))),
        compiler_params=pltpu.CompilerParams(dimension_semantics=("parallel",)),
    )(q_nle, kv_nse, pos_nsp,
      p["wqT"], p["bq"], p["wkvT"], p["bkv"], p["woTh"], p["bo"])
    return out, attn, pos_out


def full_layer_pallas(q_nld, kv_nsd, ap, tp, nhead):
    N, L, D = q_nld.shape
    S = kv_nsd.shape[1]
    kernel = functools.partial(_full_layer_kernel, nhead=nhead)
    out, attn = pl.pallas_call(
        kernel,
        out_shape=(jax.ShapeDtypeStruct((N, L, D), jnp.float32),
                   jax.ShapeDtypeStruct((N, L, S), jnp.float32)),
        grid=(N,),
        in_specs=[pl.BlockSpec((1, L, D), lambda n: (n, 0, 0)),
                  pl.BlockSpec((1, S, D), lambda n: (n, 0, 0)),
                  _const_spec(ap["wqT"]), _const_spec(ap["bq"]),
                  _const_spec(ap["wkvT"]), _const_spec(ap["bkv"]),
                  _const_spec(ap["woTh"]), _const_spec(ap["bo"]),
                  _const_spec(tp["g1"]), _const_spec(tp["be1"]),
                  _const_spec(tp["w1T"]), _const_spec(tp["b1"]),
                  _const_spec(tp["w2T"]), _const_spec(tp["b2"]),
                  _const_spec(tp["g2"]), _const_spec(tp["be2"])],
        out_specs=(pl.BlockSpec((1, L, D), lambda n: (n, 0, 0)),
                   pl.BlockSpec((1, L, S), lambda n: (n, 0, 0))),
        compiler_params=pltpu.CompilerParams(dimension_semantics=("parallel",)),
    )(q_nld, kv_nsd,
      ap["wqT"], ap["bq"], ap["wkvT"], ap["bkv"], ap["woTh"], ap["bo"],
      tp["g1"], tp["be1"], tp["w1T"], tp["b1"], tp["w2T"], tp["b2"],
      tp["g2"], tp["be2"])
    return out, attn


# -----------------------------------------------------------------------------
# Module wrapper with deterministic parameter initialization.
# -----------------------------------------------------------------------------
def _xavier_uniform(key, shape):
    fan_out, fan_in = shape
    lim = (6.0 / (fan_in + fan_out)) ** 0.5
    return jax.random.uniform(key, shape, jnp.float32, -lim, lim)


class TransformerEncoderLayerPallas:
    def __init__(self, d_model, d_pos, nhead, dim_feedforward=2048, dropout=0.1,
                 activation="relu", start_layer=True, return_attention_map=True,
                 key=None):
        assert activation == "relu"  # TODO(synk): gelu/glu not wired up here
        self.d_model = d_model
        self.d_pos = d_pos
        self.nhead = nhead
        self.start_layer = start_layer
        self.return_attention_map = return_attention_map
        key = jax.random.PRNGKey(0) if key is None else key
        ks = jax.random.split(key, 8)

        e_attn = d_model - d_pos if start_layer else d_model
        assert e_attn % nhead == 0
        hd = e_attn // nhead

        in_proj = _xavier_uniform(ks[0], (3 * e_attn, e_attn))   # like nn.MultiheadAttention
        wq, wk, wv = (in_proj[:e_attn], in_proj[e_attn:2 * e_attn], in_proj[2 * e_attn:])
        wo = _xavier_uniform(ks[1], (e_attn, e_attn))
        bq = 0.01 * jax.random.normal(ks[2], (1, e_attn), jnp.float32)
        bk = 0.01 * jax.random.normal(ks[3], (1, e_attn), jnp.float32)
        bv = 0.01 * jax.random.normal(ks[4], (1, e_attn), jnp.float32)
        self.attn_params = {
            # matmul weights stored bf16 (f32 accumulation in-kernel); biases f32
            "wqT": wq.T.astype(jnp.bfloat16),                                   # [E, E]
            "wkvT": jnp.concatenate([wk.T, wv.T], axis=1).astype(jnp.bfloat16), # [E, 2E]
            "bq": bq,
            "bkv": jnp.concatenate([bk, bv], axis=1),                           # [1, 2E]
            "woTh": wo.T.reshape(nhead, hd, e_attn).astype(jnp.bfloat16),       # [H, hd, E]
            "bo": jnp.zeros((1, e_attn), jnp.float32),
        }

        if not start_layer:
            D, Fdim = d_model, dim_feedforward
            w1 = _xavier_uniform(ks[5], (Fdim, D))
            w2 = _xavier_uniform(ks[6], (D, Fdim))
            self.tail_params = {
                "g1": jnp.ones((1, D), jnp.float32), "be1": jnp.zeros((1, D), jnp.float32),
                "w1T": w1.T.astype(jnp.bfloat16),
                "b1": 0.01 * jax.random.normal(ks[7], (1, Fdim), jnp.float32),
                "w2T": w2.T.astype(jnp.bfloat16),
                "b2": jnp.zeros((1, D), jnp.float32),
                "g2": jnp.ones((1, D), jnp.float32), "be2": jnp.zeros((1, D), jnp.float32),
            }

    def __call__(self, src, pos_src, query, query_pos=None):
        # src:[S,N,E] pos_src:[S,N,E_p] query:[L,N,E] query_pos:[L,N,E_p]
        if src.shape[2] != query.shape[2] or src.shape[2] + pos_src.shape[2] != self.d_model:
            raise ValueError(
                f"Error in dimension checking - {self.d_model}, {src.shape[2]}, "
                f"{pos_src.shape[2]}, {query.shape[2]}")
        if self.start_layer:
            q_nle = jnp.transpose(query, (1, 0, 2))
            kv_nse = jnp.transpose(src, (1, 0, 2))
            pos_nsp = jnp.transpose(pos_src, (1, 0, 2))
            out_nle, attn, pos_nlp = start_layer_pallas(
                q_nle, kv_nse, pos_nsp, self.attn_params, self.nhead)
            tgt = jnp.transpose(out_nle, (1, 0, 2))          # [L, N, E]
            pos_tgt = jnp.transpose(pos_nlp, (1, 0, 2))      # [L, N, E_p]
        else:
            E = query.shape[2]
            q_nld = jnp.transpose(jnp.concatenate([query, query_pos], axis=2), (1, 0, 2))
            kv_nsd = jnp.transpose(jnp.concatenate([src, pos_src], axis=2), (1, 0, 2))
            out_nld, attn = full_layer_pallas(
                q_nld, kv_nsd, self.attn_params, self.tail_params, self.nhead)
            out = jnp.transpose(out_nld, (1, 0, 2))          # [L, N, D]
            tgt, pos_tgt = out[:, :, :E], out[:, :, E:]
        if self.return_attention_map:
            return tgt, pos_tgt, attn
        return tgt, pos_tgt, None


if __name__ == "__main__":
    S, L, N = 16, 8, 2
    d_model, d_pos, nhead, dff = 48, 16, 4, 64
    E = d_model - d_pos

    key = jax.random.PRNGKey(0)
    k1, k2, k3, k4 = jax.random.split(key, 4)
    src = jax.random.normal(k1, (S, N, E), jnp.float32)
    pos_src = jax.random.normal(k2, (S, N, d_pos), jnp.float32)
    query = jax.random.normal(k3, (L, N, E), jnp.float32)
    query_pos = jax.random.normal(k4, (L, N, d_pos), jnp.float32)

    # start layer (default configuration)
    layer_start = TransformerEncoderLayerPallas(
        d_model, d_pos, nhead, dim_feedforward=dff, start_layer=True,
        key=jax.random.PRNGKey(42))
    tgt, pos_tgt, attn = layer_start(src, pos_src, query)
    jax.block_until_ready((tgt, pos_tgt, attn))
    assert tgt.shape == (L, N, E)
    assert pos_tgt.shape == (L, N, d_pos)
    assert attn.shape == (N, L, S)
    # approx reciprocal in the softmax => loose tolerance on row sums
    assert bool(jnp.allclose(jnp.sum(attn, axis=-1), 1.0, atol=1e-2))
    assert bool(jnp.all(jnp.isfinite(tgt)))

    # non-start layer (residual + layernorm + FFN path)
    layer_mid = TransformerEncoderLayerPallas(
        d_model, d_pos, nhead, dim_feedforward=dff, start_layer=False,
        key=jax.random.PRNGKey(7))
    tgt2, pos_tgt2, attn2 = layer_mid(src, pos_src, query, query_pos)
    jax.block_until_ready((tgt2, pos_tgt2, attn2))
    assert tgt2.shape == (L, N, E)
    assert pos_tgt2.shape == (L, N, d_pos)
    assert attn2.shape == (N, L, S)
    assert bool(jnp.allclose(jnp.sum(attn2, axis=-1), 1.0, atol=1e-2))
    assert bool(jnp.all(jnp.isfinite(tgt2)))

    print("KERNEL_OK")
</pallas_src>

<mosaic_0001>
module attributes {stable_mosaic.version = 11 : i64} {
  func.func @_start_layer_kernel(%arg0: i32, %arg1: memref<1x8x32xf32, #tpu.memory_space<vmem>>, %arg2: memref<1x16x32xf32, #tpu.memory_space<vmem>>, %arg3: memref<1x16x16xf32, #tpu.memory_space<vmem>>, %arg4: memref<32x32xbf16, #tpu.memory_space<vmem>>, %arg5: memref<1x32xf32, #tpu.memory_space<vmem>>, %arg6: memref<32x64xbf16, #tpu.memory_space<vmem>>, %arg7: memref<1x64xf32, #tpu.memory_space<vmem>>, %arg8: memref<4x8x32xbf16, #tpu.memory_space<vmem>>, %arg9: memref<1x32xf32, #tpu.memory_space<vmem>>, %arg10: memref<1x8x32xf32, #tpu.memory_space<vmem>>, %arg11: memref<1x8x16xf32, #tpu.memory_space<vmem>>, %arg12: memref<1x8x16xf32, #tpu.memory_space<vmem>>) attributes {dimension_semantics = [#tpu.dimension_semantics<parallel>], iteration_bounds = array<i64: 2>, scalar_prefetch = 0 : i64, scratch_operands = 0 : i64, tpu.core_type = #tpu.core_type<tc>, window_params = [{transform_indices = @transform_0, window_bounds = array<i64: 1, 8, 32>}, {transform_indices = @transform_1, window_bounds = array<i64: 1, 16, 32>}, {transform_indices = @transform_2, window_bounds = array<i64: 1, 16, 16>}, {pipeline_mode = #tpu.pipeline_mode<synchronous>, transform_indices = @transform_3, window_bounds = array<i64: 32, 32>}, {pipeline_mode = #tpu.pipeline_mode<synchronous>, transform_indices = @transform_4, window_bounds = array<i64: 1, 32>}, {pipeline_mode = #tpu.pipeline_mode<synchronous>, transform_indices = @transform_5, window_bounds = array<i64: 32, 64>}, {pipeline_mode = #tpu.pipeline_mode<synchronous>, transform_indices = @transform_6, window_bounds = array<i64: 1, 64>}, {pipeline_mode = #tpu.pipeline_mode<synchronous>, transform_indices = @transform_7, window_bounds = array<i64: 4, 8, 32>}, {pipeline_mode = #tpu.pipeline_mode<synchronous>, transform_indices = @transform_8, window_bounds = array<i64: 1, 32>}, {transform_indices = @transform_9, window_bounds = array<i64: 1, 8, 32>}, {transform_indices = @transform_10, window_bounds = array<i64: 1, 8, 16>}, {transform_indices = @transform_11, window_bounds = array<i64: 1, 8, 16>}]} {
    %c0 = arith.constant 0 : index
    %c0_0 = arith.constant 0 : index
    %c0_1 = arith.constant 0 : index
    %0 = vector.load %arg1[%c0, %c0_0, %c0_1] : memref<1x8x32xf32, #tpu.memory_space<vmem>>, vector<1x8x32xf32>
    %1 = vector.shape_cast %0 : vector<1x8x32xf32> to vector<8x32xf32>
    %c0_2 = arith.constant 0 : index
    %c0_3 = arith.constant 0 : index
    %c0_4 = arith.constant 0 : index
    %2 = vector.load %arg2[%c0_2, %c0_3, %c0_4] : memref<1x16x32xf32, #tpu.memory_space<vmem>>, vector<1x16x32xf32>
    %3 = vector.shape_cast %2 : vector<1x16x32xf32> to vector<16x32xf32>
    %c0_5 = arith.constant 0 : index
    %c0_6 = arith.constant 0 : index
    %4 = vector.load %arg4[%c0_5, %c0_6] : memref<32x32xbf16, #tpu.memory_space<vmem>>, vector<32x32xbf16>
    %c0_7 = arith.constant 0 : index
    %c0_8 = arith.constant 0 : index
    %5 = vector.load %arg5[%c0_7, %c0_8] : memref<1x32xf32, #tpu.memory_space<vmem>>, vector<1x32xf32>
    %c0_9 = arith.constant 0 : index
    %c0_10 = arith.constant 0 : index
    %6 = vector.load %arg6[%c0_9, %c0_10] : memref<32x64xbf16, #tpu.memory_space<vmem>>, vector<32x64xbf16>
    %c0_11 = arith.constant 0 : index
    %c0_12 = arith.constant 0 : index
    %7 = vector.load %arg7[%c0_11, %c0_12] : memref<1x64xf32, #tpu.memory_space<vmem>>, vector<1x64xf32>
    %c0_13 = arith.constant 0 : index
    %c0_14 = arith.constant 0 : index
    %c0_15 = arith.constant 0 : index
    %8 = vector.load %arg8[%c0_13, %c0_14, %c0_15] : memref<4x8x32xbf16, #tpu.memory_space<vmem>>, vector<4x8x32xbf16>
    %c0_16 = arith.constant 0 : index
    %c0_17 = arith.constant 0 : index
    %9 = vector.load %arg9[%c0_16, %c0_17] : memref<1x32xf32, #tpu.memory_space<vmem>>, vector<1x32xf32>
    %10 = arith.truncf %1 : vector<8x32xf32> to vector<8x32xbf16>
    %cst = arith.constant dense<0.000000e+00> : vector<8x32xf32>
    %11 = tpu.matmul %10, %4, %cst {dimension_numbers = #tpu.dot_dimension_numbers<[1], [0], [0], [1], [0, 0, 1, 1], [], []>} : vector<8x32xbf16>, vector<32x32xbf16>, vector<8x32xf32> -> vector<8x32xf32>
    %12 = vector.broadcast %5 : vector<1x32xf32> to vector<8x32xf32>
    %13 = arith.addf %11, %12 : vector<8x32xf32>
    %14 = arith.truncf %3 : vector<16x32xf32> to vector<16x32xbf16>
    %cst_18 = arith.constant dense<0.000000e+00> : vector<16x64xf32>
    %15 = tpu.matmul %14, %6, %cst_18 {dimension_numbers = #tpu.dot_dimension_numbers<[1], [0], [0], [1], [0, 0, 1, 1], [], []>} : vector<16x32xbf16>, vector<32x64xbf16>, vector<16x64xf32> -> vector<16x64xf32>
    %16 = vector.broadcast %7 : vector<1x64xf32> to vector<16x64xf32>
    %17 = arith.addf %15, %16 : vector<16x64xf32>
    %18 = vector.extract_strided_slice %17 {offsets = [0, 0], sizes = [16, 32], strides = [1, 1]} : vector<16x64xf32> to vector<16x32xf32>
    %19 = vector.extract_strided_slice %17 {offsets = [0, 32], sizes = [16, 32], strides = [1, 1]} : vector<16x64xf32> to vector<16x32xf32>
    %cst_19 = arith.constant 0.000000e+00 : f32
    %20 = vector.broadcast %cst_19 : f32 to vector<8x16xf32>
    %cst_20 = arith.constant 0.000000e+00 : f32
    %21 = vector.broadcast %cst_20 : f32 to vector<8x32xf32>
    %22 = vector.extract_strided_slice %13 {offsets = [0, 0], sizes = [8, 8], strides = [1, 1]} : vector<8x32xf32> to vector<8x8xf32>
    %23 = vector.extract_strided_slice %18 {offsets = [0, 0], sizes = [16, 8], strides = [1, 1]} : vector<16x32xf32> to vector<16x8xf32>
    %24 = vector.extract_strided_slice %19 {offsets = [0, 0], sizes = [16, 8], strides = [1, 1]} : vector<16x32xf32> to vector<16x8xf32>
    %25 = arith.truncf %22 : vector<8x8xf32> to vector<8x8xbf16>
    %26 = tpu.transpose %23, [1, 0] : vector<16x8xf32> -> vector<8x16xf32>
    %27 = arith.truncf %26 : vector<8x16xf32> to vector<8x16xbf16>
    %cst_21 = arith.constant dense<0.000000e+00> : vector<8x16xf32>
    %28 = tpu.matmul %25, %27, %cst_21 {dimension_numbers = #tpu.dot_dimension_numbers<[1], [0], [0], [1], [0, 0, 1, 1], [], []>} : vector<8x8xbf16>, vector<8x16xbf16>, vector<8x16xf32> -> vector<8x16xf32>
    %cst_22 = arith.constant 0.353553385 : f32
    %29 = vector.broadcast %cst_22 : f32 to vector<8x16xf32>
    %30 = arith.mulf %28, %29 : vector<8x16xf32>
    %cst_23 = arith.constant dense<0xFF800000> : vector<8xf32>
    %31 = vector.multi_reduction <maximumf>, %30, %cst_23 [1] : vector<8x16xf32> to vector<8xf32>
    %32 = vector.shape_cast %31 : vector<8xf32> to vector<8x1xf32>
    %33 = vector.broadcast %32 : vector<8x1xf32> to vector<8x16xf32>
    %34 = arith.subf %30, %33 : vector<8x16xf32>
    %35 = math.exp %34 : vector<8x16xf32>
    %cst_24 = arith.constant dense<0.000000e+00> : vector<8xf32>
    %36 = vector.multi_reduction <add>, %35, %cst_24 [1] : vector<8x16xf32> to vector<8xf32>
    %37 = vector.shape_cast %36 : vector<8xf32> to vector<8x1xf32>
    %38 = tpu.reciprocal %37 {approx = true} : vector<8x1xf32> -> vector<8x1xf32>
    %39 = vector.broadcast %38 : vector<8x1xf32> to vector<8x16xf32>
    %40 = arith.mulf %35, %39 : vector<8x16xf32>
    %41 = arith.addf %20, %40 : vector<8x16xf32>
    %42 = arith.truncf %40 : vector<8x16xf32> to vector<8x16xbf16>
    %43 = arith.truncf %24 : vector<16x8xf32> to vector<16x8xbf16>
    %cst_25 = arith.constant dense<0.000000e+00> : vector<8x8xf32>
    %44 = tpu.matmul %42, %43, %cst_25 {dimension_numbers = #tpu.dot_dimension_numbers<[1], [0], [0], [1], [0, 0, 1, 1], [], []>} : vector<8x16xbf16>, vector<16x8xbf16>, vector<8x8xf32> -> vector<8x8xf32>
    %45 = arith.truncf %44 : vector<8x8xf32> to vector<8x8xbf16>
    %46 = vector.extract_strided_slice %8 {offsets = [0, 0, 0], sizes = [1, 8, 32], strides = [1, 1, 1]} : vector<4x8x32xbf16> to vector<1x8x32xbf16>
    %47 = vector.shape_cast %46 : vector<1x8x32xbf16> to vector<8x32xbf16>
    %cst_26 = arith.constant dense<0.000000e+00> : vector<8x32xf32>
    %48 = tpu.matmul %45, %47, %cst_26 {dimension_numbers = #tpu.dot_dimension_numbers<[1], [0], [0], [1], [0, 0, 1, 1], [], []>} : vector<8x8xbf16>, vector<8x32xbf16>, vector<8x32xf32> -> vector<8x32xf32>
    %49 = arith.addf %21, %48 : vector<8x32xf32>
    %50 = vector.extract_strided_slice %13 {offsets = [0, 8], sizes = [8, 8], strides = [1, 1]} : vector<8x32xf32> to vector<8x8xf32>
    %51 = vector.extract_strided_slice %18 {offsets = [0, 8], sizes = [16, 8], strides = [1, 1]} : vector<16x32xf32> to vector<16x8xf32>
    %52 = vector.extract_strided_slice %19 {offsets = [0, 8], sizes = [16, 8], strides = [1, 1]} : vector<16x32xf32> to vector<16x8xf32>
    %53 = arith.truncf %50 : vector<8x8xf32> to vector<8x8xbf16>
    %54 = tpu.transpose %51, [1, 0] : vector<16x8xf32> -> vector<8x16xf32>
    %55 = arith.truncf %54 : vector<8x16xf32> to vector<8x16xbf16>
    %cst_27 = arith.constant dense<0.000000e+00> : vector<8x16xf32>
    %56 = tpu.matmul %53, %55, %cst_27 {dimension_numbers = #tpu.dot_dimension_numbers<[1], [0], [0], [1], [0, 0, 1, 1], [], []>} : vector<8x8xbf16>, vector<8x16xbf16>, vector<8x16xf32> -> vector<8x16xf32>
    %cst_28 = arith.constant 0.353553385 : f32
    %57 = vector.broadcast %cst_28 : f32 to vector<8x16xf32>
    %58 = arith.mulf %56, %57 : vector<8x16xf32>
    %cst_29 = arith.constant dense<0xFF800000> : vector<8xf32>
    %59 = vector.multi_reduction <maximumf>, %58, %cst_29 [1] : vector<8x16xf32> to vector<8xf32>
    %60 = vector.shape_cast %59 : vector<8xf32> to vector<8x1xf32>
    %61 = vector.broadcast %60 : vector<8x1xf32> to vector<8x16xf32>
    %62 = arith.subf %58, %61 : vector<8x16xf32>
    %63 = math.exp %62 : vector<8x16xf32>
    %cst_30 = arith.constant dense<0.000000e+00> : vector<8xf32>
    %64 = vector.multi_reduction <add>, %63, %cst_30 [1] : vector<8x16xf32> to vector<8xf32>
    %65 = vector.shape_cast %64 : vector<8xf32> to vector<8x1xf32>
    %66 = tpu.reciprocal %65 {approx = true} : vector<8x1xf32> -> vector<8x1xf32>
    %67 = vector.broadcast %66 : vector<8x1xf32> to vector<8x16xf32>
    %68 = arith.mulf %63, %67 : vector<8x16xf32>
    %69 = arith.addf %41, %68 : vector<8x16xf32>
    %70 = arith.truncf %68 : vector<8x16xf32> to vector<8x16xbf16>
    %71 = arith.truncf %52 : vector<16x8xf32> to vector<16x8xbf16>
    %cst_31 = arith.constant dense<0.000000e+00> : vector<8x8xf32>
    %72 = tpu.matmul %70, %71, %cst_31 {dimension_numbers = #tpu.dot_dimension_numbers<[1], [0], [0], [1], [0, 0, 1, 1], [], []>} : vector<8x16xbf16>, vector<16x8xbf16>, vector<8x8xf32> -> vector<8x8xf32>
    %73 = arith.truncf %72 : vector<8x8xf32> to vector<8x8xbf16>
    %74 = vector.extract_strided_slice %8 {offsets = [1, 0, 0], sizes = [1, 8, 32], strides = [1, 1, 1]} : vector<4x8x32xbf16> to vector<1x8x32xbf16>
    %75 = vector.shape_cast %74 : vector<1x8x32xbf16> to vector<8x32xbf16>
    %cst_32 = arith.constant dense<0.000000e+00> : vector<8x32xf32>
    %76 = tpu.matmul %73, %75, %cst_32 {dimension_numbers = #tpu.dot_dimension_numbers<[1], [0], [0], [1], [0, 0, 1, 1], [], []>} : vector<8x8xbf16>, vector<8x32xbf16>, vector<8x32xf32> -> vector<8x32xf32>
    %77 = arith.addf %49, %76 : vector<8x32xf32>
    %78 = vector.extract_strided_slice %13 {offsets = [0, 16], sizes = [8, 8], strides = [1, 1]} : vector<8x32xf32> to vector<8x8xf32>
    %79 = vector.extract_strided_slice %18 {offsets = [0, 16], sizes = [16, 8], strides = [1, 1]} : vector<16x32xf32> to vector<16x8xf32>
    %80 = vector.extract_strided_slice %19 {offsets = [0, 16], sizes = [16, 8], strides = [1, 1]} : vector<16x32xf32> to vector<16x8xf32>
    %81 = arith.truncf %78 : vector<8x8xf32> to vector<8x8xbf16>
    %82 = tpu.transpose %79, [1, 0] : vector<16x8xf32> -> vector<8x16xf32>
    %83 = arith.truncf %82 : vector<8x16xf32> to vector<8x16xbf16>
    %cst_33 = arith.constant dense<0.000000e+00> : vector<8x16xf32>
    %84 = tpu.matmul %81, %83, %cst_33 {dimension_numbers = #tpu.dot_dimension_numbers<[1], [0], [0], [1], [0, 0, 1, 1], [], []>} : vector<8x8xbf16>, vector<8x16xbf16>, vector<8x16xf32> -> vector<8x16xf32>
    %cst_34 = arith.constant 0.353553385 : f32
    %85 = vector.broadcast %cst_34 : f32 to vector<8x16xf32>
    %86 = arith.mulf %84, %85 : vector<8x16xf32>
    %cst_35 = arith.constant dense<0xFF800000> : vector<8xf32>
    %87 = vector.multi_reduction <maximumf>, %86, %cst_35 [1] : vector<8x16xf32> to vector<8xf32>
    %88 = vector.shape_cast %87 : vector<8xf32> to vector<8x1xf32>
    %89 = vector.broadcast %88 : vector<8x1xf32> to vector<8x16xf32>
    %90 = arith.subf %86, %89 : vector<8x16xf32>
    %91 = math.exp %90 : vector<8x16xf32>
    %cst_36 = arith.constant dense<0.000000e+00> : vector<8xf32>
    %92 = vector.multi_reduction <add>, %91, %cst_36 [1] : vector<8x16xf32> to vector<8xf32>
    %93 = vector.shape_cast %92 : vector<8xf32> to vector<8x1xf32>
    %94 = tpu.reciprocal %93 {approx = true} : vector<8x1xf32> -> vector<8x1xf32>
    %95 = vector.broadcast %94 : vector<8x1xf32> to vector<8x16xf32>
    %96 = arith.mulf %91, %95 : vector<8x16xf32>
    %97 = arith.addf %69, %96 : vector<8x16xf32>
    %98 = arith.truncf %96 : vector<8x16xf32> to vector<8x16xbf16>
    %99 = arith.truncf %80 : vector<16x8xf32> to vector<16x8xbf16>
    %cst_37 = arith.constant dense<0.000000e+00> : vector<8x8xf32>
    %100 = tpu.matmul %98, %99, %cst_37 {dimension_numbers = #tpu.dot_dimension_numbers<[1], [0], [0], [1], [0, 0, 1, 1], [], []>} : vector<8x16xbf16>, vector<16x8xbf16>, vector<8x8xf32> -> vector<8x8xf32>
    %101 = arith.truncf %100 : vector<8x8xf32> to vector<8x8xbf16>
    %102 = vector.extract_strided_slice %8 {offsets = [2, 0, 0], sizes = [1, 8, 32], strides = [1, 1, 1]} : vector<4x8x32xbf16> to vector<1x8x32xbf16>
    %103 = vector.shape_cast %102 : vector<1x8x32xbf16> to vector<8x32xbf16>
    %cst_38 = arith.constant dense<0.000000e+00> : vector<8x32xf32>
    %104 = tpu.matmul %101, %103, %cst_38 {dimension_numbers = #tpu.dot_dimension_numbers<[1], [0], [0], [1], [0, 0, 1, 1], [], []>} : vector<8x8xbf16>, vector<8x32xbf16>, vector<8x32xf32> -> vector<8x32xf32>
    %105 = arith.addf %77, %104 : vector<8x32xf32>
    %106 = vector.extract_strided_slice %13 {offsets = [0, 24], sizes = [8, 8], strides = [1, 1]} : vector<8x32xf32> to vector<8x8xf32>
    %107 = vector.extract_strided_slice %18 {offsets = [0, 24], sizes = [16, 8], strides = [1, 1]} : vector<16x32xf32> to vector<16x8xf32>
    %108 = vector.extract_strided_slice %19 {offsets = [0, 24], sizes = [16, 8], strides = [1, 1]} : vector<16x32xf32> to vector<16x8xf32>
    %109 = arith.truncf %106 : vector<8x8xf32> to vector<8x8xbf16>
    %110 = tpu.transpose %107, [1, 0] : vector<16x8xf32> -> vector<8x16xf32>
    %111 = arith.truncf %110 : vector<8x16xf32> to vector<8x16xbf16>
    %cst_39 = arith.constant dense<0.000000e+00> : vector<8x16xf32>
    %112 = tpu.matmul %109, %111, %cst_39 {dimension_numbers = #tpu.dot_dimension_numbers<[1], [0], [0], [1], [0, 0, 1, 1], [], []>} : vector<8x8xbf16>, vector<8x16xbf16>, vector<8x16xf32> -> vector<8x16xf32>
    %cst_40 = arith.constant 0.353553385 : f32
    %113 = vector.broadcast %cst_40 : f32 to vector<8x16xf32>
    %114 = arith.mulf %112, %113 : vector<8x16xf32>
    %cst_41 = arith.constant dense<0xFF800000> : vector<8xf32>
    %115 = vector.multi_reduction <maximumf>, %114, %cst_41 [1] : vector<8x16xf32> to vector<8xf32>
    %116 = vector.shape_cast %115 : vector<8xf32> to vector<8x1xf32>
    %117 = vector.broadcast %116 : vector<8x1xf32> to vector<8x16xf32>
    %118 = arith.subf %114, %117 : vector<8x16xf32>
    %119 = math.exp %118 : vector<8x16xf32>
    %cst_42 = arith.constant dense<0.000000e+00> : vector<8xf32>
    %120 = vector.multi_reduction <add>, %119, %cst_42 [1] : vector<8x16xf32> to vector<8xf32>
    %121 = vector.shape_cast %120 : vector<8xf32> to vector<8x1xf32>
    %122 = tpu.reciprocal %121 {approx = true} : vector<8x1xf32> -> vector<8x1xf32>
    %123 = vector.broadcast %122 : vector<8x1xf32> to vector<8x16xf32>
    %124 = arith.mulf %119, %123 : vector<8x16xf32>
    %125 = arith.addf %97, %124 : vector<8x16xf32>
    %126 = arith.truncf %124 : vector<8x16xf32> to vector<8x16xbf16>
    %127 = arith.truncf %108 : vector<16x8xf32> to vector<16x8xbf16>
    %cst_43 = arith.constant dense<0.000000e+00> : vector<8x8xf32>
    %128 = tpu.matmul %126, %127, %cst_43 {dimension_numbers = #tpu.dot_dimension_numbers<[1], [0], [0], [1], [0, 0, 1, 1], [], []>} : vector<8x16xbf16>, vector<16x8xbf16>, vector<8x8xf32> -> vector<8x8xf32>
    %129 = arith.truncf %128 : vector<8x8xf32> to vector<8x8xbf16>
    %130 = vector.extract_strided_slice %8 {offsets = [3, 0, 0], sizes = [1, 8, 32], strides = [1, 1, 1]} : vector<4x8x32xbf16> to vector<1x8x32xbf16>
    %131 = vector.shape_cast %130 : vector<1x8x32xbf16> to vector<8x32xbf16>
    %cst_44 = arith.constant dense<0.000000e+00> : vector<8x32xf32>
    %132 = tpu.matmul %129, %131, %cst_44 {dimension_numbers = #tpu.dot_dimension_numbers<[1], [0], [0], [1], [0, 0, 1, 1], [], []>} : vector<8x8xbf16>, vector<8x32xbf16>, vector<8x32xf32> -> vector<8x32xf32>
    %133 = arith.addf %105, %132 : vector<8x32xf32>
    %134 = vector.broadcast %9 : vector<1x32xf32> to vector<8x32xf32>
    %135 = arith.addf %133, %134 : vector<8x32xf32>
    %cst_45 = arith.constant 2.500000e-01 : f32
    %136 = vector.broadcast %cst_45 : f32 to vector<8x16xf32>
    %137 = arith.mulf %125, %136 : vector<8x16xf32>
    %c0_46 = arith.constant 0 : index
    %c0_47 = arith.constant 0 : index
    %c0_48 = arith.constant 0 : index
    %138 = vector.load %arg3[%c0_46, %c0_47, %c0_48] : memref<1x16x16xf32, #tpu.memory_space<vmem>>, vector<1x16x16xf32>
    %139 = vector.shape_cast %138 : vector<1x16x16xf32> to vector<16x16xf32>
    %cst_49 = arith.constant dense<0.000000e+00> : vector<8x16xf32>
    %140 = tpu.matmul %137, %139, %cst_49 {dimension_numbers = #tpu.dot_dimension_numbers<[1], [0], [0], [1], [0, 0, 1, 1], [], []>} : vector<8x16xf32>, vector<16x16xf32>, vector<8x16xf32> -> vector<8x16xf32>
    %c0_50 = arith.constant 0 : index
    %c0_51 = arith.constant 0 : index
    %c0_52 = arith.constant 0 : index
    %141 = vector.load %arg10[%c0_50, %c0_51, %c0_52] : memref<1x8x32xf32, #tpu.memory_space<vmem>>, vector<1x8x32xf32>
    %142 = vector.shape_cast %141 : vector<1x8x32xf32> to vector<8x32xf32>
    %143 = vector.shape_cast %135 : vector<8x32xf32> to vector<1x8x32xf32>
    tpu.vector_store %arg10[%c0_50, %c0_51, %c0_52], %143 {strides = array<i32>} : memref<1x8x32xf32, #tpu.memory_space<vmem>>, vector<1x8x32xf32>,
    %c0_53 = arith.constant 0 : index
    %c0_54 = arith.constant 0 : index
    %c0_55 = arith.constant 0 : index
    %144 = vector.load %arg11[%c0_53, %c0_54, %c0_55] : memref<1x8x16xf32, #tpu.memory_space<vmem>>, vector<1x8x16xf32>
    %145 = vector.shape_cast %144 : vector<1x8x16xf32> to vector<8x16xf32>
    %146 = vector.shape_cast %137 : vector<8x16xf32> to vector<1x8x16xf32>
    tpu.vector_store %arg11[%c0_53, %c0_54, %c0_55], %146 {strides = array<i32>} : memref<1x8x16xf32, #tpu.memory_space<vmem>>, vector<1x8x16xf32>,
    %c0_56 = arith.constant 0 : index
    %c0_57 = arith.constant 0 : index
    %c0_58 = arith.constant 0 : index
    %147 = vector.load %arg12[%c0_56, %c0_57, %c0_58] : memref<1x8x16xf32, #tpu.memory_space<vmem>>, vector<1x8x16xf32>
    %148 = vector.shape_cast %147 : vector<1x8x16xf32> to vector<8x16xf32>
    %149 = vector.shape_cast %140 : vector<8x16xf32> to vector<1x8x16xf32>
    tpu.vector_store %arg12[%c0_56, %c0_57, %c0_58], %149 {strides = array<i32>} : memref<1x8x16xf32, #tpu.memory_space<vmem>>, vector<1x8x16xf32>,
    return
  }
  func.func @transform_0(%arg0: i32) -> (i32, i32, i32) {
    %c0_i32 = arith.constant 0 : i32
    %c0_i32_0 = arith.constant 0 : i32
    %c0_i32_1 = arith.constant 0 : i32
    return %arg0, %c0_i32, %c0_i32_0 : i32, i32, i32
  }
  func.func @transform_1(%arg0: i32) -> (i32, i32, i32) {
    %c0_i32 = arith.constant 0 : i32
    %c0_i32_0 = arith.constant 0 : i32
    %c0_i32_1 = arith.constant 0 : i32
    return %arg0, %c0_i32, %c0_i32_0 : i32, i32, i32
  }
  func.func @transform_2(%arg0: i32) -> (i32, i32, i32) {
    %c0_i32 = arith.constant 0 : i32
    %c0_i32_0 = arith.constant 0 : i32
    %c0_i32_1 = arith.constant 0 : i32
    return %arg0, %c0_i32, %c0_i32_0 : i32, i32, i32
  }
  func.func @transform_3(%arg0: i32) -> (i32, i32) {
    %c0_i32 = arith.constant 0 : i32
    %c0_i32_0 = arith.constant 0 : i32
    %c0_i32_1 = arith.constant 0 : i32
    return %c0_i32, %c0_i32_0 : i32, i32
  }
  func.func @transform_4(%arg0: i32) -> (i32, i32) {
    %c0_i32 = arith.constant 0 : i32
    %c0_i32_0 = arith.constant 0 : i32
    %c0_i32_1 = arith.constant 0 : i32
    return %c0_i32, %c0_i32_0 : i32, i32
  }
  func.func @transform_5(%arg0: i32) -> (i32, i32) {
    %c0_i32 = arith.constant 0 : i32
    %c0_i32_0 = arith.constant 0 : i32
    %c0_i32_1 = arith.constant 0 : i32
    return %c0_i32, %c0_i32_0 : i32, i32
  }
  func.func @transform_6(%arg0: i32) -> (i32, i32) {
    %c0_i32 = arith.constant 0 : i32
    %c0_i32_0 = arith.constant 0 : i32
    %c0_i32_1 = arith.constant 0 : i32
    return %c0_i32, %c0_i32_0 : i32, i32
  }
  func.func @transform_7(%arg0: i32) -> (i32, i32, i32) {
    %c0_i32 = arith.constant 0 : i32
    %c0_i32_0 = arith.constant 0 : i32
    %c0_i32_1 = arith.constant 0 : i32
    %c0_i32_2 = arith.constant 0 : i32
    return %c0_i32, %c0_i32_0, %c0_i32_1 : i32, i32, i32
  }
  func.func @transform_8(%arg0: i32) -> (i32, i32) {
    %c0_i32 = arith.constant 0 : i32
    %c0_i32_0 = arith.constant 0 : i32
    %c0_i32_1 = arith.constant 0 : i32
    return %c0_i32, %c0_i32_0 : i32, i32
  }
  func.func @transform_9(%arg0: i32) -> (i32, i32, i32) {
    %c0_i32 = arith.constant 0 : i32
    %c0_i32_0 = arith.constant 0 : i32
    %c0_i32_1 = arith.constant 0 : i32
    return %arg0, %c0_i32, %c0_i32_0 : i32, i32, i32
  }
  func.func @transform_10(%arg0: i32) -> (i32, i32, i32) {
    %c0_i32 = arith.constant 0 : i32
    %c0_i32_0 = arith.constant 0 : i32
    %c0_i32_1 = arith.constant 0 : i32
    return %arg0, %c0_i32, %c0_i32_0 : i32, i32, i32
  }
  func.func @transform_11(%arg0: i32) -> (i32, i32, i32) {
    %c0_i32 = arith.constant 0 : i32
    %c0_i32_0 = arith.constant 0 : i32
    %c0_i32_1 = arith.constant 0 : i32
    return %arg0, %c0_i32, %c0_i32_0 : i32, i32, i32
  }
}

</mosaic_0001>

<bundles_post_ra>
// kernel: tpu_custom_call.1
= control target key start
LH: loop header
LB: loop body
LE: loop exit
PB: predicated region body
PF: predicated region fallthrough
CT: control target
= control target key end

     0   :  { %s2341_s0 = inlined_call_operand.hbm [shape: f32[2,8,32], index: 0, kind: input, shape index: {}]   ;;  %s2342_s1 = inlined_call_operand.hbm [shape: f32[2,16,32], index: 1, kind: input, shape index: {}]   ;;  %s2343_s2 = inlined_call_operand.hbm [shape: f32[2,16,16], index: 2, kind: input, shape index: {}]   ;;  %s2344_s3 = inlined_call_operand.hbm [shape: bf16[32,32], index: 3, kind: input, shape index: {}]   ;;  %s2345_s4 = inlined_call_operand.vmem [shape: f32[1,32], index: 4, kind: input, shape index: {}]   ;;  %s2346_s5 = inlined_call_operand.hbm [shape: bf16[32,64], index: 5, kind: input, shape index: {}]   ;;  %s2347_s6 = inlined_call_operand.vmem [shape: f32[1,64], index: 6, kind: input, shape index: {}]   ;;  %s2348_s7 = inlined_call_operand.hbm [shape: bf16[4,8,32], index: 7, kind: input, shape index: {}]   ;;  %s2349_s8 = inlined_call_operand.vmem [shape: f32[1,32], index: 8, kind: input, shape index: {}]   ;;  %s2350_s9 = inlined_call_operand.hbm [shape: f32[2,8,32], index: 9, kind: output, shape index: {0}]   ;;  %s2351_s10 = inlined_call_operand.hbm [shape: f32[2,8,16], index: 10, kind: output, shape index: {1}]   ;;  %s2352_s11 = inlined_call_operand.hbm [shape: f32[2,8,16], index: 11, kind: output, shape index: {2}]  }
   0x1   :  { %2372 = sst [smem:[#allocation29_spill]] %s2342_s1 }
   0x2   :  { %2373 = sst [smem:[#allocation30_spill]] %s2344_s3 }
   0x3   :  { %2374 = sst [smem:[#allocation31_spill]] %s2349_s8 }
   0x4   :  { %2375 = sst [smem:[#allocation32_spill]] %s2350_s9 }
   0x5   :  { %2376 = sst [smem:[#allocation33_spill]] %s2351_s10 }
   0x6   :  { %2377 = sst [smem:[#allocation34_spill]] %s2352_s11 }
   0x7   :  { %17 = vsyncpa [#allocation3], 0 }
   0x8   :  { %19 = vsyncpa [#allocation3 + $0x1], 0 }
   0x9   :  { %20 = vsyncpa [#allocation6], 0 }
   0xa   :  { %22 = vsyncpa [#allocation6 + $0x1], 0 }
   0xb   :  { %23 = vsyncpa [#allocation9], 0 }
   0xc   :  { %24 = vsyncpa [#allocation12], 0 }
   0xd   :  { %25 = vsyncpa [#allocation4], 0 }
   0xe   :  { %27 = vsyncpa [#allocation4 + $0x1], 0 }
   0xf   :  { %28 = vsyncpa [#allocation15], 0 }
  0x10   :  { %30 = vsyncpa [#allocation15 + $0x1], 0  ;;  %s1991_s17 = smov 0   ;;  %s1993_s18 = smov 0  }
  0x11   :  { %s1995_s19 = smov 0   ;;  %s1997_s20 = smov 0  }
  0x12 LB: > { %2378 = sst [smem:[#allocation23_spill]] %s1903_s17  ;;  %s2012_s21 = sadd.s32 4294967295, %s1915_s20   ;;  %s1915_s20 = sphi %s1997_s20, %s2410_s20   ;;  %s1911_s19 = sphi %s1995_s19, %s2412_s19   ;;  %s1907_s18 = sphi %s1993_s18, %s2414_s18   ;;  %s1903_s17 = sphi %s1991_s17, %s2413_s17  }
  0x13   : > { %2379 = sst [smem:[#allocation24_spill]] %s1911_s19  ;;  %s2353_s22 = sadd.s32 4294967294, %s1915_s20  }
  0x14   : > { %p56_p0 = scmp.ne.s32.totalorder %s1907_s18, %s1903_s17  ;;  %p2364_p1 = scmp.eq.s32.totalorder %s2012_s21, 0 }
  0x15   : > { %p258_p2 = scmp.eq.s32.totalorder %s2012_s21, 1  ;;  %p264_p3 = scmp.eq.s32.totalorder %s2353_s22, 1 }
  0x16   : > { %p2023_p4 = por %p2364_p1, %p56_p0  ;;  %p1386_p5 = scmp.ge.s32.totalorder %s1915_s20, 1 }
  0x17   : > { %p2028_p6 = por %p264_p3, %p56_p0  ;;  %p323_p7 = scmp.lt.s32.totalorder %s1915_s20, 3 }
  0x18   : > { %s2383_s3 = sld [smem:[#allocation30_spill]]  ;;  %s1917_s29 = smov [#allocation8]  }
  0x19   : > { %s2381_s24 = scalar_select %p2028_p6, 1, 0 }
  0x1a   : > { %p2036_p8 = pnand %p1386_p5, %p323_p7  ;;  %s336_s30 = sshll.u32 %s1917_s29, 4  ;;  %s337_s30 = int_to_ptr.vmem [resolvable:$true] %s336_s30 }
  0x1b   : > { %2382 = sst [smem:[#allocation25_spill]] %s2381_s24  ;;  %s2050_s13 = sadd.s32 1, %s1915_s20  }
  0x1c   : > { %p1478_p9 = pneg %p2036_p8  ;;  %2386 = sst [smem:[#allocation26_spill]] %s2050_s13 }
  0x1d   : > { %s2354_s14 = smov 64   ;;  %s2356_s15 = smov 4  }
  0x1e   : > { %s334_s27 = sshll.u32 %s2383_s3, 4  ;;  %p2044_p10 = pnand %p1478_p9, %p2364_p1  ;;  %s335_s27 = int_to_ptr.hbm [resolvable:$true] %s334_s27 }
  0x1f   : > { %s40_s16 = ssub.s32 %s1915_s20, %s2050_s13  ;;  %s43_s25 = sadd.s32 1, %s1911_s19 }
  0x20   : > { %1481 = dma.hbm_to_vmem [thread:$0]  (!%p2044_p10), %s335_s27, 256, %s337_s30, [#allocation9], %s2354_s14, %s2354_s14, %s2356_s15  }
  0x21   : > { %p41_p12 = scmp.eq.s32.totalorder %s40_s16, 0  ;;  %p50_p13 = scmp.ne.s32.totalorder %s1911_s19, %s1907_s18 }
  0x22   : > { %p51_p0 = scmp.eq.s32.totalorder %s1915_s20, 0  ;;  %p1511_p3 = scmp.lt.s32.totalorder %s1915_s20, 2 }
  0x23   : > { %s2065_s26 = scalar_select %p41_p12, %s1911_s19, %s43_s25  }
  0x24   : > { %p52_p5 = por %p51_p0, %p50_p13  ;;  %p2069_p7 = por %p258_p2, %p50_p13 }
  0x25   : > { %2387 = sst [smem:[#allocation27_spill]] %s2065_s26  ;;  %s2074_s22 = sand.u32 1, %s1911_s19  }
  0x26   : > { %s2388_s29 = scalar_select %p2069_p7, 1, 0 }
  0x27   : > { %s406_s3 = sand.u32 1, %s1915_s20   ;;  %p2077_p9 = pnand %p1511_p3, %p52_p5 }
  0x28   : > { %2389 = sst [smem:[#allocation28_spill]] %s2388_s29  ;;  %s2363_s30 = sshll.u32 %s2074_s22, 4 }
  0x29   : > { %s1448_s16 = sshll.u32 %s1915_s20, 4  ;;  %s2391_s1 = sld [smem:[#allocation29_spill]] }
  0x2a   : > { %s410_s26 = scalar_lea.vmem [#allocation5], %s2363_s30  ;;  %s2088_s24 = scalar_lea.sflag [#allocation6], %s406_s3 }
  0x2b   : > { %s418_s13 = sshll.u32 %s410_s26, 4  ;;  %p1631_p12 = pneg %p2077_p9  ;;  %s419_s13 = int_to_ptr.vmem [resolvable:$true] %s418_s13 }
  0x2f   : > { %s415_s15 = scalar_lea.hbm %s2391_s1, %s1448_s16  ;;  %s1634_s30 = scalar_lea.hbm %s2391_s1, 32 }
  0x30   : > { %s416_s19 = sshll.u32 %s415_s15, 4  ;;  %s417_s19 = int_to_ptr.hbm [resolvable:$true] %s416_s19 }
  0x31   : > { %s1627_s17 = sshra.s32 %s417_s19, 4  ;;  %s1628_s17 = int_to_ptr.hbm [resolvable:$true] %s1627_s17 }
  0x32   : > { %s1629_s8 = scalar_lea.hbm %s1628_s17, 16  ;;  %p1635_p3 = scmp.lt.s32.totalorder %s1628_s17, %s2391_s1 }
  0x33   : > { %p1630_p2 = scmp.ne.s32.totalorder %s1628_s17, %s1629_s8  ;;  %p1636_p5 = scmp.lt.s32.totalorder %s1634_s30, %s1629_s8 }
  0x35   : > { %p1632_p13 = pnand %p1631_p12, %p1630_p2  ;;  %p1637_p11 = por %p1636_p5, %p1635_p3 }
  0x37   : > { %p1633_p0 = pneg %p1632_p13 }
  0x39   : > { %p1638_p1 = pnand %p1637_p11, %p1633_p0 }
  0x3b   : > { %1641 = shalt.err (!%p1638_p1)
}
  0x3c   : > { %s2370_s3 = smov 128   ;;  %s2371_s9 = smov 8  }
  0x3d   : > { %1494 = dma.hbm_to_vmem [thread:$0]  (!%p2077_p9), %s417_s19, 256, %s419_s13, %s2088_s24, %s2370_s3, %s2370_s3, %s2371_s9  }
  0x3e   : > { %s437_s17 = scalar_lea.hbm %s2343_s2, %s1448_s16  ;;  %s2392_s8 = sshll.u32 %s2074_s22, 4 }
  0x3f   : > { %s432_s30 = scalar_lea.vmem [#allocation7], %s2392_s8  ;;  %s438_s15 = sshll.u32 %s437_s17, 4  ;;  %s2135_s15 = int_to_ptr.hbm [resolvable:$true] %s438_s15 }
  0x40   : > { %s440_s26 = sshll.u32 %s432_s30, 4  ;;  %s351_s10 = sshll.u32 %s2346_s5, 4  ;;  %s2112_s26 = int_to_ptr.vmem [resolvable:$true] %s440_s26  ;;  %s352_s10 = int_to_ptr.hbm [resolvable:$true] %s351_s10 }
  0x41   : > { %s1922_s29 = smov [#allocation10]   ;;  %s368_s14 = sshll.u32 %s2348_s7, 4  ;;  %s369_s14 = int_to_ptr.hbm [resolvable:$true] %s368_s14 }
  0x42   : > { %s353_s19 = sshll.u32 %s1922_s29, 4  ;;  %s2393_s16 = smov 4   ;;  %s354_s19 = int_to_ptr.vmem [resolvable:$true] %s353_s19 }
  0x43   : > { %s2394_s25 = smov 64   ;;  %s1923_s17 = smov [#allocation11]  }
  0x44   : > { %1484 = dma.hbm_to_vmem [thread:$0]  (!%p2044_p10), %s352_s10, 256, %s354_s19, [#allocation9], %s2394_s25, %s2394_s25, %s2393_s16  }
  0x45   : > { %s370_s8 = sshll.u32 %s1923_s17, 4  ;;  %s1391_s30 = sshll.u32 %s2074_s22, 3  ;;  %s371_s8 = int_to_ptr.vmem [resolvable:$true] %s370_s8 }
  0x46   : > { %1487 = dma.hbm_to_vmem [thread:$0]  (!%p2044_p10), %s369_s14, 256, %s371_s8, [#allocation12], %s2394_s25, %s2394_s25, %s2393_s16  }
  0x47   : > { %s1392_s1 = sshll.u32 %s1915_s20, 3  ;;  %s391_s11 = scalar_lea.vmem [#allocation2], %s1391_s30 }
  0x48   : > { %s399_s29 = sshll.u32 %s391_s11, 4  ;;  %s395_s9 = scalar_lea.hbm %s2341_s0, %s1392_s1  ;;  %s400_s29 = int_to_ptr.vmem [resolvable:$true] %s399_s29 }
  0x49   : > { %s397_s10 = sshll.u32 %s395_s9, 4  ;;  %s388_s19 = scalar_lea.sflag [#allocation3], %s2074_s22  ;;  %s398_s10 = int_to_ptr.hbm [resolvable:$true] %s397_s10 }
  0x4a   : > { %s1717_s17 = sshra.s32 %s398_s10, 4  ;;  %s1724_s25 = scalar_lea.hbm %s2341_s0, 16  ;;  %s1718_s17 = int_to_ptr.hbm [resolvable:$true] %s1717_s17 }
  0x4b   : > { %s1719_s12 = scalar_lea.hbm %s1718_s17, 8  ;;  %p1725_p2 = scmp.lt.s32.totalorder %s1718_s17, %s2341_s0 }
  0x4c   : > { %p1720_p1 = scmp.ne.s32.totalorder %s1718_s17, %s1719_s12  ;;  %p1726_p13 = scmp.lt.s32.totalorder %s1724_s25, %s1719_s12 }
  0x4e   : > { %p1722_p10 = pnand %p1720_p1, %p1631_p12  ;;  %p1727_p0 = por %p1726_p13, %p1725_p2 }
  0x50   : > { %p1723_p11 = pneg %p1722_p10 }
  0x52   : > { %p1728_p3 = pnand %p1727_p0, %p1723_p11 }
  0x54   : > { %1731 = shalt.err (!%p1728_p3)
}
  0x55   : > { %1491 = dma.hbm_to_vmem [thread:$0]  (!%p2077_p9), %s398_s10, 128, %s400_s29, %s388_s19  }
  0x56   : > { %s1747_s9 = sshra.s32 %s2135_s15, 4  ;;  %s1754_s3 = scalar_lea.hbm %s2343_s2, 32  ;;  %s1748_s9 = int_to_ptr.hbm [resolvable:$true] %s1747_s9 }
  0x57   : > { %s1749_s22 = scalar_lea.hbm %s1748_s9, 16  ;;  %p1755_p11 = scmp.lt.s32.totalorder %s1748_s9, %s2343_s2 }
  0x58   : > { %p1750_p5 = scmp.ne.s32.totalorder %s1748_s9, %s1749_s22  ;;  %p1756_p2 = scmp.lt.s32.totalorder %s1754_s3, %s1749_s22 }
  0x5a   : > { %p1752_p1 = pnand %p1750_p5, %p1631_p12  ;;  %p1757_p13 = por %p1756_p2, %p1755_p11 }
  0x5c   : > { %p1753_p10 = pneg %p1752_p1 }
  0x5e   : > { %p1758_p0 = pnand %p1757_p13, %p1753_p10 }
  0x60   : > { %1761 = shalt.err (!%p1758_p0)
}
  0x61   : > { %s2395_s29 = smov 8   ;;  %s2396_s10 = smov 128  }
  0x62   : > { %1497 = dma.hbm_to_vmem [thread:$0]  (!%p2077_p9), %s2135_s15, 256, %s2112_s26, %s2088_s24, %s2396_s10, %s2396_s10, %s2395_s29  }
  0x63   : > { %452 = sbr.rel (%p2036_p8) target bundleno = 1640 (0x668), region = 56  ;;  %s2170_s19 = sand.u32 (!%p2036_p8), 1, %s1907_s18  }
  0x64   : > { %s2173_s12 = sshll.u32 (!%p2036_p8), %s2170_s19, 3  ;;  %s455_s27 = scalar_lea.sflag (!%p2036_p8), [#allocation3], %s2170_s19 }
  0x65   : > { %s458_s14 = scalar_lea.vmem (!%p2036_p8), [#allocation2], %s2173_s12 }
  0x68   : > { %1878 = dma.done.wait (%p2023_p4), %s455_s27, 128  }
  0x69   : > { %1880 = vsyncadd (%p2023_p4), %s455_s27, 4294967168  ;;  %s464_s24 = sand.u32 1, %s2012_s21   ;;  %s1401_s28 = sshll.u32 %s2170_s19, 4 }
  0x6a   : > { %s465_s26 = scalar_lea.sflag [#allocation6], %s464_s24  ;;  %s468_s15 = scalar_lea.vmem [#allocation5], %s1401_s28 }
  0x6b   : > { %1882 = dma.done.wait (%p2023_p4), %s465_s26, 512  }
  0x6c   : > { %1884 = vsyncadd (%p2023_p4), %s465_s26, 4294966784  ;;  %s2189_s16 = scalar_lea.vmem [#allocation7], %s1401_s28  ;;  %p2397_p8 = scmp.eq.s32.totalorder %s2012_s21, 0 }
  0x6e   : > { %1886 = dma.done.wait (%p2397_p8), [#allocation9], 512   ;;  %p2398_p9 = pmov %p2397_p8 }
  0x6f   : > { %p2399_p12 = pmov %p2397_p8 }
  0x70   : > { %1888 = vsyncadd (%p2398_p9), [#allocation9], 4294966784 }
  0x71   : > { %1890 = dma.done.wait (%p2399_p12), [#allocation12], 256   ;;  %p2400_p3 = pmov %p2397_p8 }
  0x72   : > { %v1453_v0 = vld [vmem:[#allocation10 + $0x8] sm:$0xff]  ;;  %v1452_v1 = vld [vmem:[#allocation10] sm:$0xff]  ;;  %v1451_v3 = vld [vmem:[#allocation8 + $0x8] sm:$0xff]  ;;  %vm588_vm0 = vcmask 261120   ;;  %s1924_s8 = smov 96   ;;  %s1925_s30 = smov 120  }
  0x73   : > { %1892 = vsyncadd (%p2400_p3), [#allocation12], 4294967040  ;;  %v555_v2 = vld [vmem:[%s468_s15] sm:$0xff]  ;;  %630 = vmatpush.bf16.msra.mxu1 %v1453_v0  ;;  %v556_v4 = vld [vmem:[%s468_s15 + $0x8] sm:$0xff]  ;;  %598 = vmatpush.bf16.msra.mxu0 %v1451_v3  ;;  %s1926_s1 = smov 104   ;;  %s1927_s11 = smov 112  }
  0x74   : > { %v1450_v5 = vld [vmem:[#allocation8] sm:$0xff]  ;;  %v554_v6 = vld [vmem:[%s458_s14] sm:$0xff]  ;;  %v605_v7 = vpack.c.bf16 %v556_v4, %v555_v2  ;;  %vm676_vm1 = vcmask 1043456   ;;  %vm672_vm2 = vcmask 64512   ;;  %vm694_vm3 = vcmask 130048   ;;  %s1928_s3 = smov 80  }
  0x75   : > { %v572_v8 = vpack.c.bf16 %v554_v6, %v554_v6  ;;  %v1578_v9 = vld [vmem:[%s2347_s6] ss:$0 sm:$0xff]  ;;  %v567_v52 = vld [vmem:[#allocation11] sm:$0xf]  ;;  %s1929_s13 = smov 88   ;;  %s1930_s17 = smov 72  }
  0x76   : > { %v1579_v18 = vld [vmem:[%s2345_s4] ss:$0 sm:$0xff]  ;;  %v850_v53 = vsel %vm676_vm1, %v567_v52, 0  ;;  %s545_s29 = scalar_lea.vmem [#allocation14], %s2173_s12  ;;  %s2260_s27 = sshll.u32 %s2012_s21, 3 }
  0x77   : > { %631 = vmatpush.bf16.msra.mxu1 %v1452_v1  ;;  %599 = vmatpush.bf16.msra.mxu0 %v1450_v5  ;;  %s2402_s26 = sld [smem:[#allocation33_spill]]  ;;  %s2270_s25 = scalar_lea.sflag [#allocation15], %s464_s24 }
  0x7a   : > { %1426 = vmatmul.msk.bf16.vlgmr.msra.gmra.mxu1 %vm588_vm0, %v605_v7  ;;  %1417 = vmatmul.msk.bf16.vlgmr.msra.gmra.mxu0 %vm588_vm0, %v572_v8 }
  0x7b   : > { %859 = vmatpush.bf16.msrb.mxu1 %v850_v53  ;;  %v569_v53 = vld [vmem:[#allocation11 + $0x8] sm:$0xf] }
  0x7d   : > { %s1161_s15 = scalar_lea.hbm %s2402_s26, %s2260_s27 }
  0x7e   : > { %s1165_s23 = sshll.u32 %s1161_s15, 4  ;;  %s1166_s23 = int_to_ptr.hbm [resolvable:$true] %s1165_s23 }
  0xf7   : > { %v633_v10 = vpop.f32.mrf.mxu1  ;;  %v601_v12 = vpop.f32.mrf.mxu0 }
  0xf8   : > { %v634_v11 = vadd.f32 %v1578_v9, %v633_v10  ;;  %v602_v19 = vadd.f32 %v1579_v18, %v601_v12 }
  0xfa   : > { %639 = vxpose.xlu0.b32.start [1/2] (short) (narrow) %v634_v11, 8  ;;  %v638_v20 = vpack.c.bf16 %v602_v19, %v602_v19 }
  0xff   : > { %v635_v13 = vpop.f32.mrf.mxu1  ;;  %v603_v15 = vpop.f32.mrf.mxu0 }
 0x100   : > { %v636_v14 = vadd.f32 %v1578_v9, %v635_v13 }
 0x102   : > { %640 = vxpose.xlu0.b32.end [2/2] (short) (narrow) %v636_v14, 8  ;;  %v2204_v16 = vpack.c.bf16 %v636_v14, %v634_v11  ;;  %v1568_v17 = vpack.i.bf16 %v636_v14, %v634_v11 }
 0x104   : > { %710 = vrot.lane.b32.xlu2 %v2204_v16, %s1924_s8  ;;  %s1791_s8 = sshra.s32 %s1166_s23, 4  ;;  %s1792_s8 = int_to_ptr.hbm [resolvable:$true] %s1791_s8 }
 0x105   : > { %p1798_p10 = scmp.lt.s32.totalorder %s1792_s8, %s2402_s26 }
 0x10c   : > { %1564 = vrot.lane.b32.xlu2 %v1568_v17, %s1925_s30 }
 0x114   : > { %1574 = vrot.lane.b32.xlu2 %v1568_v17, %s1926_s1 }
 0x11c   : > { %904 = vrot.lane.b32.xlu2 %v638_v20, %s1927_s11 }
 0x15e   : > { %v711_v21 = vpop.permute.xlu2 %710 }
 0x15f   : > { %723 = vmatpush.bf16.msra.mxu3 %v711_v21 }
 0x166   : > { %v1565_v22 = vpop.permute.xlu2 %1564 }
 0x167   : > { %v1566_v23 = vunpack.i.l.bf16 %v1565_v22  ;;  %v1567_v24 = vunpack.i.h.bf16 %v1565_v22 }
 0x169   : > { %738 = vxpose.xlu2.b32.start [1/2] (short) (narrow) %v1566_v23, 8 }
 0x16e   : > { %v1575_v25 = vpop.permute.xlu2 %1574 }
 0x16f   : > { %v1576_v26 = vunpack.i.l.bf16 %v1575_v25  ;;  %v1577_v27 = vunpack.i.h.bf16 %v1575_v25 }
 0x170   : > { %1569 = vrot.lane.b32.xlu0 %v1568_v17, %s1927_s11 }
 0x171   : > { %739 = vxpose.xlu2.b32.end [2/2] (short) (narrow) %v1567_v24, 8 }
 0x176   : > { %v905_v42 = vpop.permute.xlu2 %904 }
 0x179   : > { %985 = vxpose.xlu2.b32.start [1/2] (short) (narrow) %v1576_v26, 8 }
 0x181   : > { %986 = vxpose.xlu2.b32.end [2/2] (short) (narrow) %v1577_v27, 8 }
 0x19e   : > { %v655_v28 = vpop.trf.xlu0 }
 0x19f   : > { %v671_v29 = vpack.c.bf16 %v655_v28, %v655_v28 }
 0x1a1   : > { %v678_v30 = vsel %vm676_vm1, %v671_v29, 0 }
 0x1a2   : > { %687 = vmatpush.bf16.msra.mxu2 %v678_v30 }
 0x1a5   : > { %1427 = vmatmul.msk.bf16.vlgmr.msra.gmra.mxu2 %vm672_vm2, %v638_v20 }
 0x1e2   : > { %v1570_v40 = vpop.permute.xlu0 %1569 }
 0x1e3   : > { %v1571_v41 = vunpack.i.l.bf16 %v1570_v40  ;;  %v1572_v43 = vunpack.i.h.bf16 %v1570_v40  ;;  %v568_v40 = vld [vmem:[#allocation11 + $0x4] sm:$0xf] }
 0x202   : > { %v754_v44 = vpop.trf.xlu2 }
 0x203   : > { %v770_v45 = vpack.c.bf16 %v754_v44, %v754_v44 }
 0x205   : > { %v778_v46 = vsel %vm676_vm1, %v770_v45, 0 }
 0x206   : > { %787 = vmatpush.bf16.msrb.mxu2 %v778_v46 }
 0x212   : > { %v1001_v54 = vpop.trf.xlu2 }
 0x213   : > { %v1017_v55 = vpack.c.bf16 %v1001_v54, %v1001_v54  ;;  %v963_v54 = vsel %vm676_vm1, %v569_v53, 0 }
 0x215   : > { %v1024_v56 = vsel %vm676_vm1, %v1017_v55, 0  ;;  %v1099_v55 = vld [vmem:[%s2189_s16 + $0x8] sm:$0xff] }
 0x216   : > { %1033 = vmatpush.bf16.msra.mxu1 %v1024_v56  ;;  %v1098_v56 = vld [vmem:[%s2189_s16] sm:$0xff]  ;;  %s1163_s16 = sshll.u32 %s545_s29, 4  ;;  %s1164_s16 = int_to_ptr.vmem [resolvable:$true] %s1163_s16 }
 0x228   : > { %v689_v31 = vpop.f32.mrf.mxu2 }
 0x229   : > { %v693_v32 = vmul.f32 0.35355338, %v689_v31 }
 0x22b   : > { %v695_v33 = vsel %vm694_vm3, %v693_v32, -inf }
 0x22c   : > { %696 = vmax.xlane.f32.xlu1 %v695_v33 }
 0x230   : > { %v691_v34 = vpop.f32.mrf.mxu2 }
 0x29f   : > { %v697_v35 = vpop.xlane.xlu1 %696 }
 0x2a0   : > { %v698_v36 = vsub.f32 %v693_v32, %v697_v35 }
 0x2a2   : > { %v699_v37 = vmul.f32 1.442695, %v698_v36 }
 0x2a4   : > { %1581 = vpow2.f32 %v699_v37 }
 0x2aa   : > { %v1582_v38 = vpop.eup %1581 }
 0x2ab   : > { %v701_v39 = vsel %vm694_vm3, %v1582_v38, 0.0 }
 0x2ac   : > { %702 = vadd.xlane.f32.xlu1 %v701_v39 }
 0x2c5   : > { %772 = vrot.lane.b32.xlu1 %v638_v20, %s1925_s30  ;;  %s1793_s30 = scalar_lea.hbm %s1792_s8, 8 }
 0x2c6   : > { %p1794_p4 = scmp.ne.s32.totalorder %s1792_s8, %s1793_s30 }
 0x2c8   : > { %p1795_p5 = pnand %p1794_p4, %p2069_p7 }
 0x2ca   : > { %p1796_p1 = pneg %p1795_p5 }
 0x2cd   : > { %1018 = vrot.lane.b32.xlu1 %v638_v20, %s1926_s1  ;;  %s1797_s1 = scalar_lea.hbm %s2402_s26, 16 }
 0x2ce   : > { %p1799_p11 = scmp.lt.s32.totalorder %s1797_s1, %s1793_s30 }
 0x2d0   : > { %p1800_p2 = por %p1799_p11, %p1798_p10 }
 0x2d2   : > { %p1801_p13 = pnand %p1800_p2, %p1796_p1 }
 0x302   : > { %871 = vxpose.xlu1.b32.start [1/2] (short) (narrow) %v1571_v41, 8  ;;  %v831_v41 = vsel %vm676_vm1, %v568_v40, 0 }
 0x303   : > { %840 = vmatpush.bf16.msrb.mxu0 %v831_v41 }
 0x307   : > { %972 = vmatpush.bf16.msra.mxu0 %v963_v54 }
 0x30a   : > { %872 = vxpose.xlu1.b32.end [2/2] (short) (narrow) %v1572_v43, 8 }
 0x31f   : > { %v703_v47 = vpop.xlane.xlu1 %702 }
 0x320   : > { %1583 = vrcp.f32 %v703_v47 }
 0x326   : > { %v1584_v48 = vpop.eup %1583 }
 0x327   : > { %v2219_v49 = vmul.f32 %v1584_v48, %v1582_v38 }
 0x329   : > { %v707_v50 = vpack.c.bf16 %v2219_v49, %v2219_v49 }
 0x32b   : > { %1428 = vmatmul.msk.bf16.vlgmr.msra.gmra.mxu3 %vm694_vm3, %v707_v50 }
 0x337   : > { %v773_v51 = vpop.permute.xlu1 %772 }
 0x338   : > { %1429 = vmatmul.msk.bf16.vlgmr.msrb.gmra.mxu2 %vm672_vm2, %v773_v51 }
 0x33f   : > { %v1019_v57 = vpop.permute.xlu1 %1018 }
 0x3a6   : > { %v887_v58 = vpop.trf.xlu1 }
 0x3a7   : > { %v903_v59 = vpack.c.bf16 %v887_v58, %v887_v58 }
 0x3a9   : > { %v910_v60 = vsel %vm676_vm1, %v903_v59, 0  ;;  %v570_v59 = vld [vmem:[#allocation11 + $0xc] sm:$0xf] }
 0x3aa   : > { %919 = vmatpush.bf16.msra.mxu2 %v910_v60  ;;  %v1077_v60 = vsel %vm676_vm1, %v570_v59, 0 }
 0x3ad   : > { %1433 = vmatmul.msk.bf16.vlgmr.msra.gmra.mxu2 %vm672_vm2, %v905_v42 }
 0x3ae   : > { %v725_v61 = vpop.f32.mrf.mxu3 }
 0x3af   : > { %v729_v62 = vpack.c.bf16 %v725_v61, %v725_v61 }
 0x3b1   : > { %1432 = vmatmul.msk.bf16.vlgmr.msrb.gmra.mxu1 %vm672_vm2, %v729_v62 }
 0x3b6   : > { %v727_v63 = vpop.f32.mrf.mxu3 }
 0x3bb   : > { %v789_v0 = vpop.f32.mrf.mxu2 }
 0x3bc   : > { %v793_v1 = vmul.f32 0.35355338, %v789_v0 }
 0x3be   : > { %v794_v2 = vsel %vm694_vm3, %v793_v1, -inf }
 0x3bf   : > { %795 = vmax.xlane.f32.xlu2 %v794_v2 }
 0x3c1   : > { %1436 = vmatmul.msk.bf16.vlgmr.msra.gmra.mxu1 %vm672_vm2, %v1019_v57 }
 0x3c3   : > { %v791_v3 = vpop.f32.mrf.mxu2 }
 0x3d7   : > { %939 = vrot.lane.b32.xlu2 %v2204_v16, %s1928_s3 }
 0x42e   : > { %v2233_v4 = vpop.f32.mrf.mxu1 }
 0x430   : > { %v921_v5 = vpop.f32.mrf.mxu2 }
 0x431   : > { %v925_v6 = vmul.f32 0.35355338, %v921_v5 }
 0x432   : > { %v796_v7 = vpop.xlane.xlu2 %795 }
 0x433   : > { %v797_v8 = vsub.f32 %v793_v1, %v796_v7  ;;  %v926_v9 = vsel %vm694_vm3, %v925_v6, -inf }
 0x434   : > { %927 = vmax.xlane.f32.xlu1 %v926_v9 }
 0x435   : > { %v798_v10 = vmul.f32 1.442695, %v797_v8 }
 0x436   : > { %v863_v11 = vpop.f32.mrf.mxu1 }
 0x437   : > { %1585 = vpow2.f32 %v798_v10 }
 0x438   : > { %v923_v12 = vpop.f32.mrf.mxu2 }
 0x43a   : > { %v940_v34 = vpop.permute.xlu2 %939 }
 0x43d   : > { %v1586_v13 = vpop.eup %1585 }
 0x43e   : > { %v1035_v14 = vpop.f32.mrf.mxu1  ;;  %v800_v15 = vsel %vm694_vm3, %v1586_v13, 0.0 }
 0x43f   : > { %801 = vadd.xlane.f32.xlu0 %v800_v15  ;;  %v1039_v17 = vmul.f32 0.35355338, %v1035_v14 }
 0x441   : > { %v1040_v19 = vsel %vm694_vm3, %v1039_v17, -inf }
 0x446   : > { %v1037_v18 = vpop.f32.mrf.mxu1 }
 0x447   : > { %1041 = vmax.xlane.f32.xlu0 %v1040_v19 }
 0x45b   : > { %807 = vrot.lane.b32.xlu0 %v2204_v16, %s1929_s13 }
 0x4a7   : > { %v928_v20 = vpop.xlane.xlu1 %927 }
 0x4a8   : > { %v929_v21 = vsub.f32 %v925_v6, %v928_v20 }
 0x4aa   : > { %v930_v22 = vmul.f32 1.442695, %v929_v21 }
 0x4ac   : > { %1587 = vpow2.f32 %v930_v22 }
 0x4b2   : > { %v1588_v23 = vpop.eup %1587  ;;  %v802_v24 = vpop.xlane.xlu0 %801 }
 0x4b3   : > { %v932_v25 = vsel %vm694_vm3, %v1588_v23, 0.0 }
 0x4b4   : > { %933 = vadd.xlane.f32.xlu0 %v932_v25 }
 0x4ba   : > { %v1042_v26 = vpop.xlane.xlu0 %1041 }
 0x4bb   : > { %v1043_v27 = vsub.f32 %v1039_v17, %v1042_v26 }
 0x4bd   : > { %v1044_v28 = vmul.f32 1.442695, %v1043_v27 }
 0x4bf   : > { %1589 = vpow2.f32 %v1044_v28 }
 0x4c0   : > { %1591 = vrcp.f32 %v802_v24 }
 0x4c5   : > { %v1590_v29 = vpop.eup %1589 }
 0x4c6   : > { %v1046_v30 = vsel %vm694_vm3, %v1590_v29, 0.0  ;;  %v1592_v31 = vpop.eup %1591 }
 0x4c7   : > { %1047 = vadd.xlane.f32.xlu1 %v1046_v30  ;;  %v804_v32 = vmul.f32 %v1592_v31, %v1586_v13 }
 0x4c9   : > { %v806_v35 = vpack.c.bf16 %v804_v32, %v804_v32  ;;  %v805_v43 = vadd.f32 %v804_v32, %v2219_v49 }
 0x4cd   : > { %v808_v33 = vpop.permute.xlu0 %807 }
 0x4ce   : > { %820 = vmatpush.bf16.msrb.mxu3 %v808_v33 }
 0x4d1   : > { %1430 = vmatmul.msk.bf16.vlgmr.msrb.gmra.mxu3 %vm694_vm3, %v806_v35 }
 0x4d2   : > { %952 = vmatpush.bf16.msra.mxu3 %v940_v34 }
 0x4d6   : > { %1086 = vmatpush.bf16.msrb.mxu3 %v1077_v60 }
 0x4e0   : > { %1053 = vrot.lane.b32.xlu1 %v2204_v16, %s1930_s17 }
 0x527   : > { %v934_v36 = vpop.xlane.xlu0 %933 }
 0x528   : > { %1593 = vrcp.f32 %v934_v36 }
 0x52e   : > { %v1594_v37 = vpop.eup %1593 }
 0x52f   : > { %v936_v38 = vmul.f32 %v1594_v37, %v1588_v23 }
 0x531   : > { %v938_v39 = vpack.c.bf16 %v936_v38, %v936_v38  ;;  %v937_v45 = vadd.f32 %v936_v38, %v805_v43 }
 0x533   : > { %1434 = vmatmul.msk.bf16.vlgmr.msra.gmra.mxu3 %vm694_vm3, %v938_v39 }
 0x53a   : > { %v1048_v42 = vpop.xlane.xlu1 %1047 }
 0x53b   : > { %1595 = vrcp.f32 %v1048_v42 }
 0x541   : > { %v1596_v44 = vpop.eup %1595 }
 0x542   : > { %v1050_v16 = vmul.f32 %v1596_v44, %v1590_v29 }
 0x544   : > { %v1051_v46 = vadd.f32 %v1050_v16, %v937_v45  ;;  %v1052_v50 = vpack.c.bf16 %v1050_v16, %v1050_v16 }
 0x546   : > { %v1097_v47 = vmul.f32 0.25, %v1051_v46 }
 0x548   : > { %1124 = vst.msk [vmem:[%s545_s29] sm:$0xff] %vm694_vm3, %v1097_v47 }
 0x552   : > { %v1054_v48 = vpop.permute.xlu1 %1053 }
 0x553   : > { %1066 = vmatpush.bf16.msrb.mxu2 %v1054_v48 }
 0x554   : > { %v822_v51 = vpop.f32.mrf.mxu3 }
 0x555   : > { %v826_v52 = vpack.c.bf16 %v822_v51, %v822_v51 }
 0x556   : > { %1437 = vmatmul.msk.bf16.vlgmr.msrb.gmra.mxu2 %vm694_vm3, %v1052_v50 }
 0x557   : > { %1431 = vmatmul.msk.bf16.vlgmr.msrb.gmra.mxu0 %vm672_vm2, %v826_v52 }
 0x558   : > { %1117 = vmatpush.msrb.mxu0 %v1099_v55 }
 0x55a   : > { %1118 = vmatpush.msrb.mxu0 %v1098_v56 }
 0x55c   : > { %v824_v49 = vpop.f32.mrf.mxu3 }
 0x5b6   : > { %v954_v57 = vpop.f32.mrf.mxu3 }
 0x5b7   : > { %v958_v58 = vpack.c.bf16 %v954_v57, %v954_v57 }
 0x5b9   : > { %1435 = vmatmul.msk.bf16.vlgmr.msra.gmra.mxu0 %vm672_vm2, %v958_v58 }
 0x5be   : > { %v956_v61 = vpop.f32.mrf.mxu3 }
 0x5c9   : > { %1439 = vmatmul.msk.f32.vlgmr.msrb.gmra.mxu0 %vm694_vm3, %v1097_v47 }
 0x5d4   : > { %v842_v62 = vpop.f32.mrf.mxu0 }
 0x5d9   : > { %v1068_v63 = vpop.f32.mrf.mxu2 }
 0x5da   : > { %v1072_v0 = vpack.c.bf16 %v1068_v63, %v1068_v63 }
 0x5dc   : > { %v844_v1 = vpop.f32.mrf.mxu0  ;;  %1438 = vmatmul.msk.bf16.vlgmr.msrb.gmra.mxu3 %vm672_vm2, %v1072_v0 }
 0x5e1   : > { %v1070_v2 = vpop.f32.mrf.mxu2 }
 0x5e2   : > { %1804 = shalt.err (!%p1801_p13)
}
 0x5e3   : > { %1473 = dma.vmem_to_hbm [thread:$0]  (%p2069_p7), %s1164_s16, 128, %s1166_s23, %s2270_s25  }
 0x5e4   : > { %s2403_s13 = sld [smem:[#allocation34_spill]]  ;;  %s552_s29 = scalar_lea.vmem [#allocation16], %s2173_s12 }
 0x5e5   : > { %s1177_s14 = sshll.u32 %s552_s29, 4  ;;  %s1178_s14 = int_to_ptr.vmem [resolvable:$true] %s1177_s14 }
 0x5ea   : > { %s1175_s17 = scalar_lea.hbm %s2403_s13, %s2260_s27  ;;  %s1825_s30 = scalar_lea.hbm %s2403_s13, 16 }
 0x5eb   : > { %s1179_s28 = sshll.u32 %s1175_s17, 4  ;;  %s1180_s28 = int_to_ptr.hbm [resolvable:$true] %s1179_s28 }
 0x5ec   : > { %s1819_s15 = sshra.s32 %s1180_s28, 4  ;;  %s1820_s15 = int_to_ptr.hbm [resolvable:$true] %s1819_s15 }
 0x5ed   : > { %s1821_s8 = scalar_lea.hbm %s1820_s15, 8  ;;  %p1826_p12 = scmp.lt.s32.totalorder %s1820_s15, %s2403_s13 }
 0x5ee   : > { %p1822_p0 = scmp.ne.s32.totalorder %s1820_s15, %s1821_s8  ;;  %p1827_p3 = scmp.lt.s32.totalorder %s1825_s30, %s1821_s8 }
 0x5f0   : > { %p1823_p8 = pnand %p1822_p0, %p2069_p7  ;;  %p1828_p4 = por %p1827_p3, %p1826_p12 }
 0x5f2   : > { %p1824_p9 = pneg %p1823_p8 }
 0x5f4   : > { %p1829_p5 = pnand %p1828_p4, %p1824_p9 }
 0x636   : > { %v974_v3 = vpop.f32.mrf.mxu0 }
 0x63e   : > { %v976_v5 = vpop.f32.mrf.mxu0 }
 0x646   : > { %v1120_v6 = vpop.f32.mrf.mxu0 }
 0x647   : > { %1125 = vst.msk [vmem:[%s552_s29] sm:$0xff] %vm694_vm3, %v1120_v6 }
 0x648   : > { %1832 = shalt.err (!%p1829_p5)
}
 0x649   : > { %1474 = dma.vmem_to_hbm [thread:$0]  (%p2069_p7), %s1178_s14, 128, %s1180_s28, %s2270_s25   ;;  %v862_v7 = vadd.f32 %v2233_v4, %v842_v62 }
 0x64a   : > { %s2404_s3 = sld [smem:[#allocation32_spill]]  ;;  %s538_s15 = scalar_lea.vmem [#allocation13], %s2173_s12 }
 0x64b   : > { %v978_v8 = vadd.f32 %v974_v3, %v862_v7  ;;  %s2405_s29 = sld [smem:[#allocation31_spill]]  ;;  %s1149_s8 = sshll.u32 %s538_s15, 4  ;;  %s1150_s8 = int_to_ptr.vmem [resolvable:$true] %s1149_s8 }
 0x64c   : > { %s1127_s25 = scalar_lea.sflag [#allocation4], %s2170_s19 }
 0x650   : > { %s1147_s21 = scalar_lea.hbm %s2404_s3, %s2260_s27  ;;  %s1853_s12 = scalar_lea.hbm %s2404_s3, 16 }
 0x651   : > { %v1580_v9 = vld [vmem:[%s2405_s29] ss:$0 sm:$0xff]  ;;  %s1151_s16 = sshll.u32 %s1147_s21, 4  ;;  %s1152_s16 = int_to_ptr.hbm [resolvable:$true] %s1151_s16 }
 0x652   : > { %s1847_s14 = sshra.s32 %s1152_s16, 4  ;;  %s1848_s14 = int_to_ptr.hbm [resolvable:$true] %s1847_s14 }
 0x653   : > { %s1849_s27 = scalar_lea.hbm %s1848_s14, 8  ;;  %p1854_p2 = scmp.lt.s32.totalorder %s1848_s14, %s2404_s3 }
 0x654   : > { %p1850_p1 = scmp.ne.s32.totalorder %s1848_s14, %s1849_s27  ;;  %p1855_p13 = scmp.lt.s32.totalorder %s1853_s12, %s1849_s27 }
 0x656   : > { %p1851_p10 = pnand %p1850_p1, %p2069_p7  ;;  %p1856_p0 = por %p1855_p13, %p1854_p2 }
 0x658   : > { %p1852_p11 = pneg %p1851_p10 }
 0x65a   : > { %p1857_p8 = pnand %p1856_p0, %p1852_p11 }
 0x65f   : > { %v1088_v10 = vpop.f32.mrf.mxu3 }
 0x660   : > { %v1092_v11 = vadd.f32 %v1088_v10, %v978_v8 }
 0x662   : > { %v1096_v12 = vadd.f32 %v1580_v9, %v1092_v11 }
 0x664   : > { %1123 = vst.msk [vmem:[%s538_s15] sm:$0xff] %vm588_vm0, %v1096_v12 }
 0x665   : > { %1860 = shalt.err (!%p1857_p8)
}
 0x666   : > { %1472 = dma.vmem_to_hbm [thread:$0]  (%p2069_p7), %s1150_s8, 128, %s1152_s16, %s1127_s25  }
 0x667   : > { %v1090_v4 = vpop.f32.mrf.mxu3 }
 0x668 PF: > { %s2406_s19 = sld [smem:[#allocation23_spill]]  ;;  %p2408_p9 = scmp.ge.s32.totalorder %s1915_s20, 2 }
 0x66a   : > { %p1499_p12 = pnand %p2408_p9, %p2028_p6 }
 0x66c   : > { %p1500_p3 = pneg %p1499_p12 }
 0x66e   : > { %s1191_s1 = sand.u32 1, %s2406_s19  }
 0x66f   : > { %s1192_s11 = scalar_lea.sflag [#allocation4], %s1191_s1 }
 0x670   : > { %1894 = dma.done.wait (%p1500_p3), %s1192_s11, 128  }
 0x671   : > { %1896 = vsyncadd (%p1500_p3), %s1192_s11, 4294967168  ;;  %s2409_s21 = sadd.s32 4294967294, %s1915_s20  }
 0x672   : > { %s1201_s24 = sand.u32 1, %s2409_s21  }
 0x673   : > { %s1202_s17 = scalar_lea.sflag [#allocation15], %s1201_s24 }
 0x674   : > { %1898 = dma.done.wait (%p1500_p3), %s1202_s17, 256  }
 0x675   : > { %1900 = vsyncadd (%p1500_p3), %s1202_s17, 4294967040  ;;  %s2410_s20 = sld [smem:[#allocation26_spill]]  ;;  %s2413_s17 = smov %s1907_s18 }
 0x676   : > { %s2411_s10 = sld [smem:[#allocation24_spill]] }
 0x677   : > { %s2412_s19 = sld [smem:[#allocation27_spill]] }
 0x67b   : > { %p33_p7 = scmp.ge.s32.totalorder %s2410_s20, 4  }
 0x67c   : > { %s2414_s18 = smov %s2411_s10 }
 0x67d   :  { %35 = sbr.rel (!%p33_p7) target bundleno = 18 (0x12), region = 169 }
 0x682   :  { %1218 = vsyncpa [#allocation3], 1 }
 0x683   :  { %1220 = vsyncpa [#allocation3 + $0x1], 1 }
 0x684   :  { %1221 = vsyncpa [#allocation6], 1 }
 0x685   :  { %1223 = vsyncpa [#allocation6 + $0x1], 1 }
 0x686   :  { %1224 = vsyncpa [#allocation9], 1 }
 0x687   :  { %1225 = vsyncpa [#allocation12], 1 }
 0x688   :  { %1226 = vsyncpa [#allocation4], 1 }
 0x689   :  { %1228 = vsyncpa [#allocation4 + $0x1], 1 }
 0x68a   :  { %1229 = vsyncpa [#allocation15], 1 }
 0x68b   :  { %1231 = vsyncpa [#allocation15 + $0x1], 1 }

</bundles_post_ra>
